<compile_context>
chip_gen: v5e
topology: v5e:2x2
jax: 0.10.0
libtpu: 0.0.40
codegen_flags: <defaults>
</compile_context>

<pallas_src>
import functools

import jax
import jax.numpy as jnp
from jax import lax
from jax.experimental import pallas as pl
from jax.experimental.pallas import tpu as pltpu


def _round_up(x: int, m: int) -> int:
    return ((x + m - 1) // m) * m


def _linear_kernel(x_ref, w_ref, o_ref, acc_ref):
    # x_ref:   (tm, tk) VMEM    — rows of x
    # w_ref:   (tn, tk) VMEM    — rows of W (PyTorch layout, NOT transposed)
    # o_ref:   (tm, tn) VMEM    — output tile
    # acc_ref: (tm, tn) f32 VMEM scratch (persists across the K grid axis)
    @pl.when(pl.program_id(2) == 0)
    def _():
        acc_ref[...] = jnp.zeros_like(acc_ref)

    # Contract last dim of x with last dim of W  ==  x @ W.T on this tile.
    acc_ref[...] += lax.dot_general(
        x_ref[...],
        w_ref[...],
        dimension_numbers=(((1,), (1,)), ((), ())),
        preferred_element_type=jnp.float32,
    )

    @pl.when(pl.program_id(2) == pl.num_programs(2) - 1)
    def _():
        o_ref[...] = acc_ref[...].astype(o_ref.dtype)


@functools.partial(jax.jit, static_argnames=("tm", "tn", "tk"))
def linear_transformation(
    x: jax.Array,
    weight: jax.Array,
    *,
    tm: int = 256,
    tn: int = 256,
    tk: int = 512,
) -> jax.Array:
    """y = x @ weight.T ;  weight has shape (output_dim, input_dim)."""
    N, K = weight.shape
    assert x.shape[-1] == K, "input_dim mismatch"

    # Accept (..., input_dim) like nn.Linear; flatten leading dims.
    lead_shape = x.shape[:-1]
    x2 = x.reshape(-1, K)
    M = x2.shape[0]

    # Clamp tiles to the (aligned) problem size; keep TPU layout constraints:
    # sublane (second-to-last) multiples of 8, lane (last) multiples of 128.
    tm = min(tm, _round_up(M, 8))
    tn = min(tn, _round_up(N, 128))
    tk = min(tk, _round_up(K, 128))

    Mp = _round_up(M, tm)
    Np = _round_up(N, tn)
    Kp = _round_up(K, tk)

    xp = x2 if (Mp == M and Kp == K) else jnp.pad(x2, ((0, Mp - M), (0, Kp - K)))
    wp = weight if (Np == N and Kp == K) else jnp.pad(
        weight, ((0, Np - N), (0, Kp - K))
    )

    dsize = jnp.dtype(x.dtype).itemsize
    # Double-buffered x / w / out tiles + f32 accumulator, plus headroom.
    tile_bytes = (2 * tm * tk + 2 * tn * tk + 2 * tm * tn) * dsize + tm * tn * 4
    vmem_limit = int(min(max(2 * tile_bytes, 16 * 1024 * 1024), 60 * 1024 * 1024))

    grid = (Mp // tm, Np // tn, Kp // tk)

    out = pl.pallas_call(
        _linear_kernel,
        out_shape=jax.ShapeDtypeStruct((Mp, Np), x.dtype),
        grid_spec=pltpu.PrefetchScalarGridSpec(
            num_scalar_prefetch=0,
            grid=grid,
            in_specs=[
                pl.BlockSpec((tm, tk), lambda i, j, k: (i, k)),  # x rows
                pl.BlockSpec((tn, tk), lambda i, j, k: (j, k)),  # W rows
            ],
            out_specs=pl.BlockSpec((tm, tn), lambda i, j, k: (i, j)),
            scratch_shapes=[pltpu.VMEM((tm, tn), jnp.float32)],
        ),
        compiler_params=pltpu.CompilerParams(
            dimension_semantics=("parallel", "parallel", "arbitrary"),
            vmem_limit_bytes=vmem_limit,
        ),
        cost_estimate=pl.CostEstimate(
            flops=2 * Mp * Np * Kp,
            transcendentals=0,
            bytes_accessed=(Mp * Kp + Np * Kp + Mp * Np) * dsize,
        ),
    )(xp, wp)

    y = out[:M, :N]
    return y.reshape(*lead_shape, N)


if __name__ == "__main__":
    key = jax.random.PRNGKey(0)
    k_w, k_x = jax.random.split(key)

    batch = 8
    input_dim = 32
    output_dim = 16

    # Deterministic synthetic weight (as would be passed to __init__).
    weight = jax.random.normal(k_w, (output_dim, input_dim), dtype=jnp.float32)
    x = jax.random.normal(k_x, (batch, input_dim), dtype=jnp.float32)

    y = linear_transformation(x, weight)
    y = jax.block_until_ready(y)

    # Correctness check against the plain-JAX reference (x @ W.T).
    y_ref = x @ weight.T
    assert y.shape == (batch, output_dim)
    assert jnp.allclose(y, y_ref, atol=1e-5, rtol=1e-5)

    print("KERNEL_OK")
</pallas_src>

<mosaic_0001>
module attributes {stable_mosaic.version = 11 : i64} {
  func.func @_linear_kernel(%arg0: i32, %arg1: i32, %arg2: i32, %arg3: memref<8x128xf32, #tpu.memory_space<vmem>>, %arg4: memref<128x128xf32, #tpu.memory_space<vmem>>, %arg5: memref<8x128xf32, #tpu.memory_space<vmem>>, %arg6: memref<8x128xf32, #tpu.memory_space<vmem>>) attributes {dimension_semantics = [#tpu.dimension_semantics<parallel>, #tpu.dimension_semantics<parallel>, #tpu.dimension_semantics<arbitrary>], iteration_bounds = array<i64: 1, 1, 1>, scalar_prefetch = 0 : i64, scratch_operands = 1 : i64, tpu.core_type = #tpu.core_type<tc>, window_params = [{transform_indices = @transform_0, window_bounds = array<i64: 8, 128>}, {transform_indices = @transform_1, window_bounds = array<i64: 128, 128>}, {transform_indices = @transform_2, window_bounds = array<i64: 8, 128>}]} {
    %c0_i32 = arith.constant 0 : i32
    %0 = arith.cmpi eq, %arg2, %c0_i32 : i32
    %1 = arith.extui %0 : i1 to i32
    %c0_i32_0 = arith.constant 0 : i32
    %2 = arith.cmpi ne, %1, %c0_i32_0 : i32
    scf.if %2 {
      %cst_10 = arith.constant 0.000000e+00 : f32
      %12 = vector.broadcast %cst_10 : f32 to vector<8x128xf32>
      %c0_11 = arith.constant 0 : index
      %c0_12 = arith.constant 0 : index
      %13 = vector.load %arg6[%c0_11, %c0_12] : memref<8x128xf32, #tpu.memory_space<vmem>>, vector<8x128xf32>
      tpu.vector_store %arg6[%c0_11, %c0_12], %12 {strides = array<i32>} : memref<8x128xf32, #tpu.memory_space<vmem>>, vector<8x128xf32>,
    } else {
    }
    %c0 = arith.constant 0 : index
    %c0_1 = arith.constant 0 : index
    %3 = vector.load %arg6[%c0, %c0_1] : memref<8x128xf32, #tpu.memory_space<vmem>>, vector<8x128xf32>
    %c0_2 = arith.constant 0 : index
    %c0_3 = arith.constant 0 : index
    %4 = vector.load %arg3[%c0_2, %c0_3] : memref<8x128xf32, #tpu.memory_space<vmem>>, vector<8x128xf32>
    %c0_4 = arith.constant 0 : index
    %c0_5 = arith.constant 0 : index
    %5 = vector.load %arg4[%c0_4, %c0_5] : memref<128x128xf32, #tpu.memory_space<vmem>>, vector<128x128xf32>
    %cst = arith.constant dense<0.000000e+00> : vector<8x128xf32>
    %6 = tpu.matmul %4, %5, %cst {dimension_numbers = #tpu.dot_dimension_numbers<[1], [1], [0], [0], [0, 0, 1, 0], [], []>} : vector<8x128xf32>, vector<128x128xf32>, vector<8x128xf32> -> vector<8x128xf32>
    %7 = arith.addf %3, %6 : vector<8x128xf32>
    %c0_6 = arith.constant 0 : index
    %c0_7 = arith.constant 0 : index
    %8 = vector.load %arg6[%c0_6, %c0_7] : memref<8x128xf32, #tpu.memory_space<vmem>>, vector<8x128xf32>
    tpu.vector_store %arg6[%c0_6, %c0_7], %7 {strides = array<i32>} : memref<8x128xf32, #tpu.memory_space<vmem>>, vector<8x128xf32>,
    %c0_i32_8 = arith.constant 0 : i32
    %9 = arith.cmpi eq, %arg2, %c0_i32_8 : i32
    %10 = arith.extui %9 : i1 to i32
    %c0_i32_9 = arith.constant 0 : i32
    %11 = arith.cmpi ne, %10, %c0_i32_9 : i32
    scf.if %11 {
      %c0_10 = arith.constant 0 : index
      %c0_11 = arith.constant 0 : index
      %12 = vector.load %arg6[%c0_10, %c0_11] : memref<8x128xf32, #tpu.memory_space<vmem>>, vector<8x128xf32>
      %c0_12 = arith.constant 0 : index
      %c0_13 = arith.constant 0 : index
      %13 = vector.load %arg5[%c0_12, %c0_13] : memref<8x128xf32, #tpu.memory_space<vmem>>, vector<8x128xf32>
      tpu.vector_store %arg5[%c0_12, %c0_13], %12 {strides = array<i32>} : memref<8x128xf32, #tpu.memory_space<vmem>>, vector<8x128xf32>,
    } else {
    }
    return
  }
  func.func @transform_0(%arg0: i32, %arg1: i32, %arg2: i32) -> (i32, i32) {
    %c0_i32 = arith.constant 0 : i32
    return %arg0, %arg2 : i32, i32
  }
  func.func @transform_1(%arg0: i32, %arg1: i32, %arg2: i32) -> (i32, i32) {
    %c0_i32 = arith.constant 0 : i32
    return %arg1, %arg2 : i32, i32
  }
  func.func @transform_2(%arg0: i32, %arg1: i32, %arg2: i32) -> (i32, i32) {
    %c0_i32 = arith.constant 0 : i32
    return %arg0, %arg1 : i32, i32
  }
}

</mosaic_0001>

<bundles_post_ra>
// kernel: linear_transformation.1
= control target key start
LH: loop header
LB: loop body
LE: loop exit
PB: predicated region body
PF: predicated region fallthrough
CT: control target
= control target key end

     0   :  { %s175_s0 = inlined_call_operand.vmem [shape: f32[8,128], index: 0, kind: input, shape index: {}]   ;;  %s176_s1 = inlined_call_operand.vmem [shape: f32[128,128], index: 1, kind: input, shape index: {}]   ;;  %s177_s2 = inlined_call_operand.hbm [shape: f32[8,128], index: 2, kind: output, shape index: {}]  }
   0x1   :  { %v34_v0 = vld [vmem:[%s176_s1 + $0x78] sm:$0xff]  ;;  %v33_v1 = vld [vmem:[%s176_s1 + $0x70] sm:$0xff] }
   0x2   :  { %35 = vmatpush.xpose.msra.mxu0 %v34_v0 }
   0x3   :  { %7 = vsyncpa [#allocation4], 0  ;;  %v32_v2 = vld [vmem:[%s176_s1 + $0x68] sm:$0xff]  ;;  %v31_v3 = vld [vmem:[%s176_s1 + $0x60] sm:$0xff]  ;;  %s105_s15 = smov [#allocation3]   ;;  %s69_s19 = sshll.u32 %s177_s2, 4  ;;  %s70_s19 = int_to_ptr.hbm [resolvable:$true] %s69_s19 }
   0x4   :  { %v30_v4 = vld [vmem:[%s176_s1 + $0x58] sm:$0xff]  ;;  %v29_v5 = vld [vmem:[%s176_s1 + $0x50] sm:$0xff]  ;;  %v28_v6 = vld [vmem:[%s176_s1 + $0x48] sm:$0xff]  ;;  %s67_s16 = sshll.u32 %s105_s15, 4  ;;  %s68_s16 = int_to_ptr.vmem [resolvable:$true] %s67_s16 }
   0x5   :  { %v27_v7 = vld [vmem:[%s176_s1 + $0x40] sm:$0xff]  ;;  %v26_v8 = vld [vmem:[%s176_s1 + $0x38] sm:$0xff]  ;;  %v25_v9 = vld [vmem:[%s176_s1 + $0x30] sm:$0xff] }
   0x6   :  { %36 = vmatpush.xpose.msra.mxu0 %v33_v1  ;;  %v24_v10 = vld [vmem:[%s176_s1 + $0x28] sm:$0xff]  ;;  %v23_v11 = vld [vmem:[%s176_s1 + $0x20] sm:$0xff]  ;;  %v22_v12 = vld [vmem:[%s176_s1 + $0x18] sm:$0xff] }
   0x7   :  { %v21_v13 = vld [vmem:[%s176_s1 + $0x10] sm:$0xff]  ;;  %v20_v14 = vld [vmem:[%s176_s1 + $0x8] sm:$0xff]  ;;  %v19_v15 = vld [vmem:[%s176_s1] sm:$0xff] }
   0x8   :  { %v18_v16 = vld [vmem:[%s175_s0] sm:$0xff] }
   0xa   :  { %37 = vmatpush.xpose.msra.mxu0 %v32_v2 }
   0xe   :  { %38 = vmatpush.xpose.msra.mxu0 %v31_v3 }
  0x12   :  { %39 = vmatpush.xpose.msra.mxu0 %v30_v4 }
  0x16   :  { %40 = vmatpush.xpose.msra.mxu0 %v29_v5 }
  0x1a   :  { %41 = vmatpush.xpose.msra.mxu0 %v28_v6 }
  0x1e   :  { %42 = vmatpush.xpose.msra.mxu0 %v27_v7 }
  0x22   :  { %43 = vmatpush.xpose.msra.mxu0 %v26_v8 }
  0x26   :  { %44 = vmatpush.xpose.msra.mxu0 %v25_v9 }
  0x2a   :  { %45 = vmatpush.xpose.msra.mxu0 %v24_v10 }
  0x2e   :  { %46 = vmatpush.xpose.msra.mxu0 %v23_v11 }
  0x32   :  { %47 = vmatpush.xpose.msra.mxu0 %v22_v12 }
  0x36   :  { %48 = vmatpush.xpose.msra.mxu0 %v21_v13 }
  0x3a   :  { %49 = vmatpush.xpose.msra.mxu0 %v20_v14 }
  0x3e   :  { %50 = vmatpush.xpose.msra.mxu0 %v19_v15 }
  0x41   :  { %51 = vmatmul.f32.vlgmr.msra.gmra.mxu0 %v18_v16 }
  0xbe   :  { %v52_v17 = vpop.f32.mrf.mxu0 }
  0xbf   :  { %61 = vst [vmem:[#allocation3] sm:$0xff] %v52_v17 }
  0xc0   :  { %72 = dma.vmem_to_hbm [thread:$0]  %s68_s16, 128, %s70_s19, [#allocation4]  }
  0xc1   :  { %103 = dma.done.wait [#allocation4], 128  }
  0xc2   :  { %104 = vsyncadd [#allocation4], 4294967168 }
  0xc3   :  { %77 = vsyncpa [#allocation4], 1 }

</bundles_post_ra>
